<compile_context>
chip_gen: v5e
topology: v5e:2x2
jax: 0.10.0
libtpu: 0.0.40
codegen_flags: <defaults>
</compile_context>

<pallas_src>
import functools

import jax
import jax.numpy as jnp
import numpy as np
from jax import lax
from jax.experimental import pallas as pl
from jax.experimental.pallas import tpu as pltpu


# ---------------------------------------------------------------------------
# Pallas kernel: a block of `NB` batch elements, activations laid out (NB*H, W*C)
# ---------------------------------------------------------------------------
def nb1d_kernel(dilated, H, W, C,
                x_ref,
                wh1_ref, bh1_ref, ww1_ref, bw1_ref,
                wh2_ref, bh2_ref, ww2_ref, bw2_ref,
                out_ref):
    NB = x_ref.shape[0]
    L = W * C
    R = NB * H

    # Residual copy in f32; rows index (n, h), lanes index (w, c).
    x = x_ref[...].reshape(R, L).astype(jnp.float32)

    # h index of every row (for zero-padding masks of the H-direction taps).
    h_idx = lax.broadcasted_iota(jnp.int32, (R, 1), 0) % H

    def h_taps(v, d):
        """im2col for the (3,1) conv: concat 3 H-shifted (zero padded) copies."""
        taps = []
        for k in range(3):
            off = (k - 1) * d               # tap offset along H (cross-correlation)
            if off == 0:
                taps.append(v)
            else:
                rolled = pltpu.roll(v, shift=(-off) % R, axis=0)   # XLU sublane roll
                valid = jnp.logical_and(h_idx + off >= 0, h_idx + off < H)
                taps.append(jnp.where(valid, rolled, 0.0))
        return jnp.concatenate(taps, axis=1).astype(jnp.bfloat16)  # (R, 3L)

    # conv3x1_1 -> relu                               (one (R,3L)@(3L,L) matmul)
    y = jnp.dot(h_taps(x, 1), wh1_ref[...],
                preferred_element_type=jnp.float32) + bh1_ref[...]
    y = jnp.maximum(y, 0.0)

    # conv1x3_1 + bn1 (folded) -> relu                (one banded (R,L)@(L,L) matmul)
    y = jnp.dot(y.astype(jnp.bfloat16), ww1_ref[...],
                preferred_element_type=jnp.float32) + bw1_ref[...]
    y = jnp.maximum(y, 0.0)

    # conv3x1_2 (dilated) -> relu
    y = jnp.dot(h_taps(y, dilated), wh2_ref[...],
                preferred_element_type=jnp.float32) + bh2_ref[...]
    y = jnp.maximum(y, 0.0)

    # conv1x3_2 (dilated) + bn2 (folded)
    y = jnp.dot(y.astype(jnp.bfloat16), ww2_ref[...],
                preferred_element_type=jnp.float32) + bw2_ref[...]

    # dropout skipped (p == 0);  relu(out + input)
    out_ref[...] = jnp.maximum(y + x, 0.0).reshape(NB, H, L).astype(out_ref.dtype)


# ---------------------------------------------------------------------------
# Wrapper: weight folding / banded weight construction + pallas_call
# ---------------------------------------------------------------------------
def non_bottleneck_1d_forward(x_nchw, params, dilated, eps=1e-3):
    N, C, H, W = x_nchw.shape
    L = W * C

    # ---- kernel weights as (3, Cin, Cout) ----
    def k3x1(w):   # (Cout, Cin, 3, 1) -> (3, Cin, Cout)
        return jnp.transpose(w[:, :, :, 0], (2, 1, 0))

    def k1x3(w):   # (Cout, Cin, 1, 3) -> (3, Cin, Cout)
        return jnp.transpose(w[:, :, 0, :], (2, 1, 0))

    # ---- fold BN (inference mode) into the preceding 1x3 convs, in f32 ----
    s1 = params["bn1_gamma"] * lax.rsqrt(params["bn1_var"] + eps)
    s2 = params["bn2_gamma"] * lax.rsqrt(params["bn2_var"] + eps)

    wk11 = k3x1(params["w11"])
    b11 = params["b11"]
    wk12 = k1x3(params["w12"]) * s1[None, None, :]
    b12 = params["b12"] * s1 + params["bn1_beta"] - params["bn1_mean"] * s1
    wk21 = k3x1(params["w21"])
    b21 = params["b21"]
    wk22 = k1x3(params["w22"]) * s2[None, None, :]
    b22 = params["b22"] * s2 + params["bn2_beta"] - params["bn2_mean"] * s2

    eyeW = jnp.eye(W, dtype=jnp.float32)

    def h_weight(wk):
        """(3,Cin,Cout) -> (3*W*C, W*C): per-tap block-diagonal (no W mixing)."""
        blocks = jnp.einsum("wv,tio->twivo", eyeW, wk)        # (3,W,Ci,W,Co)
        return blocks.reshape(3 * L, L)

    def w_weight(wk, dil):
        """(3,Cin,Cout) -> banded (W*C, W*C) encoding the (1,3) dilated conv +
        implicit zero padding along W."""
        acc = jnp.zeros((W, C, W, C), dtype=jnp.float32)
        for k in range(3):
            off = (k - 1) * dil                               # w_in = w_out + off
            S = jnp.eye(W, k=-off, dtype=jnp.float32)         # S[w_in, w_out]
            acc = acc + jnp.einsum("wv,io->wivo", S, wk[k])
        return acc.reshape(L, L)

    bf16 = jnp.bfloat16
    WH1 = h_weight(wk11).astype(bf16)
    WW1 = w_weight(wk12, 1).astype(bf16)
    WH2 = h_weight(wk21).astype(bf16)
    WW2 = w_weight(wk22, dilated).astype(bf16)

    BH1 = jnp.tile(b11, W).reshape(1, L).astype(jnp.float32)
    BW1 = jnp.tile(b12, W).reshape(1, L).astype(jnp.float32)
    BH2 = jnp.tile(b21, W).reshape(1, L).astype(jnp.float32)
    BW2 = jnp.tile(b22, W).reshape(1, L).astype(jnp.float32)

    # ---- lane-dense activation layout: (N, H, W*C) ----
    x_lanes = jnp.transpose(x_nchw, (0, 2, 3, 1)).reshape(N, H, L)

    # process several batch elements per grid step (largest divisor of N <= 8)
    block_n = next(b for b in range(min(N, 8), 0, -1) if N % b == 0)
    grid = (N // block_n,)

    def full(shape):
        return pl.BlockSpec(shape, lambda n, _s=len(shape): (0,) * _s)

    out = pl.pallas_call(
        functools.partial(nb1d_kernel, dilated, H, W, C),
        out_shape=jax.ShapeDtypeStruct((N, H, L), x_nchw.dtype),
        grid=grid,
        in_specs=[
            pl.BlockSpec((block_n, H, L), lambda n: (n, 0, 0)),   # x
            full((3 * L, L)), full((1, L)),                        # conv3x1_1
            full((L, L)), full((1, L)),                            # conv1x3_1 (+bn1)
            full((3 * L, L)), full((1, L)),                        # conv3x1_2
            full((L, L)), full((1, L)),                            # conv1x3_2 (+bn2)
        ],
        out_specs=pl.BlockSpec((block_n, H, L), lambda n: (n, 0, 0)),
        compiler_params=pltpu.CompilerParams(
            dimension_semantics=("parallel",)),
    )(x_lanes, WH1, BH1, WW1, BW1, WH2, BH2, WW2, BW2)

    return jnp.transpose(out.reshape(N, H, W, C), (0, 3, 1, 2))   # -> NCHW


# ---------------------------------------------------------------------------
# Pure-JAX reference (lax conv, NCHW) for correctness check
# ---------------------------------------------------------------------------
def reference_forward(x, params, dilated, eps=1e-3):
    def conv(x, w, b, pad, dil):
        y = lax.conv_general_dilated(
            x, w, window_strides=(1, 1), padding=pad, rhs_dilation=dil,
            dimension_numbers=("NCHW", "OIHW", "NCHW"))
        return y + b[None, :, None, None]

    def bn(x, g, be, m, v):
        return ((x - m[None, :, None, None])
                * (g / jnp.sqrt(v + eps))[None, :, None, None]
                + be[None, :, None, None])

    d = dilated
    y = conv(x, params["w11"], params["b11"], [(1, 1), (0, 0)], (1, 1))
    y = jnp.maximum(y, 0.0)
    y = conv(y, params["w12"], params["b12"], [(0, 0), (1, 1)], (1, 1))
    y = bn(y, params["bn1_gamma"], params["bn1_beta"],
           params["bn1_mean"], params["bn1_var"])
    y = jnp.maximum(y, 0.0)
    y = conv(y, params["w21"], params["b21"], [(d, d), (0, 0)], (d, 1))
    y = jnp.maximum(y, 0.0)
    y = conv(y, params["w22"], params["b22"], [(0, 0), (d, d)], (1, d))
    y = bn(y, params["bn2_gamma"], params["bn2_beta"],
           params["bn2_mean"], params["bn2_var"])
    return jnp.maximum(y + x, 0.0)


# ---------------------------------------------------------------------------
if __name__ == "__main__":
    N, C, H, W = 2, 8, 16, 16      # W*C = 128 -> fully lane-dense blocks
    dilated = 2
    dropprob = 0.0                 # matches the `if self.dropout.p != 0` skip path

    key = jax.random.PRNGKey(0)
    keys = jax.random.split(key, 16)
    f32 = jnp.float32

    params = {
        "w11": 0.1 * jax.random.normal(keys[0], (C, C, 3, 1), f32),
        "b11": 0.05 * jax.random.normal(keys[1], (C,), f32),
        "w12": 0.1 * jax.random.normal(keys[2], (C, C, 1, 3), f32),
        "b12": 0.05 * jax.random.normal(keys[3], (C,), f32),
        "w21": 0.1 * jax.random.normal(keys[4], (C, C, 3, 1), f32),
        "b21": 0.05 * jax.random.normal(keys[5], (C,), f32),
        "w22": 0.1 * jax.random.normal(keys[6], (C, C, 1, 3), f32),
        "b22": 0.05 * jax.random.normal(keys[7], (C,), f32),
        "bn1_gamma": 1.0 + 0.1 * jax.random.normal(keys[8], (C,), f32),
        "bn1_beta": 0.1 * jax.random.normal(keys[9], (C,), f32),
        "bn1_mean": 0.1 * jax.random.normal(keys[10], (C,), f32),
        "bn1_var": 0.5 + jax.random.uniform(keys[11], (C,), f32),
        "bn2_gamma": 1.0 + 0.1 * jax.random.normal(keys[12], (C,), f32),
        "bn2_beta": 0.1 * jax.random.normal(keys[13], (C,), f32),
        "bn2_mean": 0.1 * jax.random.normal(keys[14], (C,), f32),
        "bn2_var": 0.5 + jax.random.uniform(keys[15], (C,), f32),
    }

    x = jax.random.normal(jax.random.PRNGKey(42), (N, C, H, W), f32)

    out = non_bottleneck_1d_forward(x, params, dilated)
    out = jax.block_until_ready(out)

    ref = jax.block_until_ready(reference_forward(x, params, dilated))
    # bf16 matmul inputs (f32 accumulation) -> looser tolerance than pure f32.
    np.testing.assert_allclose(np.asarray(out), np.asarray(ref),
                               rtol=3e-2, atol=3e-2)

    print("KERNEL_OK")
</pallas_src>

<mosaic_0001>
module attributes {stable_mosaic.version = 11 : i64} {
  func.func @nb1d_kernel(%arg0: i32, %arg1: memref<2x16x128xf32, #tpu.memory_space<vmem>>, %arg2: memref<384x128xbf16, #tpu.memory_space<vmem>>, %arg3: memref<1x128xf32, #tpu.memory_space<vmem>>, %arg4: memref<128x128xbf16, #tpu.memory_space<vmem>>, %arg5: memref<1x128xf32, #tpu.memory_space<vmem>>, %arg6: memref<384x128xbf16, #tpu.memory_space<vmem>>, %arg7: memref<1x128xf32, #tpu.memory_space<vmem>>, %arg8: memref<128x128xbf16, #tpu.memory_space<vmem>>, %arg9: memref<1x128xf32, #tpu.memory_space<vmem>>, %arg10: memref<2x16x128xf32, #tpu.memory_space<vmem>>) attributes {dimension_semantics = [#tpu.dimension_semantics<parallel>], iteration_bounds = array<i64: 1>, scalar_prefetch = 0 : i64, scratch_operands = 0 : i64, tpu.core_type = #tpu.core_type<tc>, window_params = [{transform_indices = @transform_0, window_bounds = array<i64: 2, 16, 128>}, {pipeline_mode = #tpu.pipeline_mode<synchronous>, transform_indices = @transform_1, window_bounds = array<i64: 384, 128>}, {pipeline_mode = #tpu.pipeline_mode<synchronous>, transform_indices = @transform_2, window_bounds = array<i64: 1, 128>}, {pipeline_mode = #tpu.pipeline_mode<synchronous>, transform_indices = @transform_3, window_bounds = array<i64: 128, 128>}, {pipeline_mode = #tpu.pipeline_mode<synchronous>, transform_indices = @transform_4, window_bounds = array<i64: 1, 128>}, {pipeline_mode = #tpu.pipeline_mode<synchronous>, transform_indices = @transform_5, window_bounds = array<i64: 384, 128>}, {pipeline_mode = #tpu.pipeline_mode<synchronous>, transform_indices = @transform_6, window_bounds = array<i64: 1, 128>}, {pipeline_mode = #tpu.pipeline_mode<synchronous>, transform_indices = @transform_7, window_bounds = array<i64: 128, 128>}, {pipeline_mode = #tpu.pipeline_mode<synchronous>, transform_indices = @transform_8, window_bounds = array<i64: 1, 128>}, {transform_indices = @transform_9, window_bounds = array<i64: 2, 16, 128>}]} {
    %c0 = arith.constant 0 : index
    %c0_0 = arith.constant 0 : index
    %c0_1 = arith.constant 0 : index
    %0 = vector.load %arg1[%c0, %c0_0, %c0_1] : memref<2x16x128xf32, #tpu.memory_space<vmem>>, vector<2x16x128xf32>
    %1 = vector.shape_cast %0 : vector<2x16x128xf32> to vector<32x128xf32>
    %2 = tpu.iota {dimensions = array<i32: 0>} : vector<32x1xi32>
    %c16_i32 = arith.constant 16 : i32
    %c0_i32 = arith.constant 0 : i32
    %3 = arith.cmpi eq, %c16_i32, %c0_i32 : i32
    %c1_i32 = arith.constant 1 : i32
    %4 = arith.select %3, %c1_i32, %c16_i32 : i32
    %5 = vector.broadcast %4 : i32 to vector<32x1xi32>
    %6 = arith.remsi %2, %5 : vector<32x1xi32>
    %c0_i32_2 = arith.constant 0 : i32
    %7 = vector.broadcast %c0_i32_2 : i32 to vector<32x1xi32>
    %8 = arith.cmpi ne, %6, %7 : vector<32x1xi32>
    %c0_i32_3 = arith.constant 0 : i32
    %9 = vector.broadcast %c0_i32_3 : i32 to vector<32x1xi32>
    %10 = arith.cmpi slt, %6, %9 : vector<32x1xi32>
    %c0_i32_4 = arith.constant 0 : i32
    %11 = arith.cmpi slt, %4, %c0_i32_4 : i32
    %12 = vector.broadcast %11 : i1 to vector<32x1xi1>
    %13 = vector.broadcast %12 : vector<32x1xi1> to vector<32x1xi1>
    %14 = arith.xori %10, %13 : vector<32x1xi1>
    %15 = arith.andi %14, %8 : vector<32x1xi1>
    %16 = vector.broadcast %4 : i32 to vector<32x1xi32>
    %17 = arith.addi %6, %16 : vector<32x1xi32>
    %18 = arith.select %15, %17, %6 : vector<32x1xi1>, vector<32x1xi32>
    %c1_i32_5 = arith.constant 1 : i32
    %19 = tpu.dynamic_rotate %1 by %c1_i32_5 dim 0 : vector<32x128xf32>, i32 -> vector<32x128xf32>
    %c-1_i32 = arith.constant -1 : i32
    %20 = vector.broadcast %c-1_i32 : i32 to vector<32x1xi32>
    %21 = arith.addi %18, %20 : vector<32x1xi32>
    %c0_i32_6 = arith.constant 0 : i32
    %22 = vector.broadcast %c0_i32_6 : i32 to vector<32x1xi32>
    %23 = arith.cmpi sge, %21, %22 : vector<32x1xi32>
    %c-1_i32_7 = arith.constant -1 : i32
    %24 = vector.broadcast %c-1_i32_7 : i32 to vector<32x1xi32>
    %25 = arith.addi %18, %24 : vector<32x1xi32>
    %c16_i32_8 = arith.constant 16 : i32
    %26 = vector.broadcast %c16_i32_8 : i32 to vector<32x1xi32>
    %27 = arith.cmpi slt, %25, %26 : vector<32x1xi32>
    %28 = arith.andi %23, %27 : vector<32x1xi1>
    %cst = arith.constant 0.000000e+00 : f32
    %29 = vector.shape_cast %28 : vector<32x1xi1> to vector<32x1xi1>
    %30 = vector.broadcast %29 : vector<32x1xi1> to vector<32x128xi1>
    %31 = vector.broadcast %cst : f32 to vector<32x128xf32>
    %32 = arith.select %30, %19, %31 : vector<32x128xi1>, vector<32x128xf32>
    %c31_i32 = arith.constant 31 : i32
    %33 = tpu.dynamic_rotate %1 by %c31_i32 dim 0 : vector<32x128xf32>, i32 -> vector<32x128xf32>
    %c1_i32_9 = arith.constant 1 : i32
    %34 = vector.broadcast %c1_i32_9 : i32 to vector<32x1xi32>
    %35 = arith.addi %18, %34 : vector<32x1xi32>
    %c0_i32_10 = arith.constant 0 : i32
    %36 = vector.broadcast %c0_i32_10 : i32 to vector<32x1xi32>
    %37 = arith.cmpi sge, %35, %36 : vector<32x1xi32>
    %c1_i32_11 = arith.constant 1 : i32
    %38 = vector.broadcast %c1_i32_11 : i32 to vector<32x1xi32>
    %39 = arith.addi %18, %38 : vector<32x1xi32>
    %c16_i32_12 = arith.constant 16 : i32
    %40 = vector.broadcast %c16_i32_12 : i32 to vector<32x1xi32>
    %41 = arith.cmpi slt, %39, %40 : vector<32x1xi32>
    %42 = arith.andi %37, %41 : vector<32x1xi1>
    %cst_13 = arith.constant 0.000000e+00 : f32
    %43 = vector.shape_cast %42 : vector<32x1xi1> to vector<32x1xi1>
    %44 = vector.broadcast %43 : vector<32x1xi1> to vector<32x128xi1>
    %45 = vector.broadcast %cst_13 : f32 to vector<32x128xf32>
    %46 = arith.select %44, %33, %45 : vector<32x128xi1>, vector<32x128xf32>
    %47 = tpu.concatenate %32, %1, %46 in 1 : vector<32x128xf32>, vector<32x128xf32>, vector<32x128xf32> -> vector<32x384xf32>
    %48 = arith.truncf %47 : vector<32x384xf32> to vector<32x384xbf16>
    %c0_14 = arith.constant 0 : index
    %c0_15 = arith.constant 0 : index
    %49 = vector.load %arg2[%c0_14, %c0_15] : memref<384x128xbf16, #tpu.memory_space<vmem>>, vector<384x128xbf16>
    %cst_16 = arith.constant dense<0.000000e+00> : vector<32x128xf32>
    %50 = tpu.matmul %48, %49, %cst_16 {dimension_numbers = #tpu.dot_dimension_numbers<[1], [0], [0], [1], [0, 0, 1, 1], [], []>} : vector<32x384xbf16>, vector<384x128xbf16>, vector<32x128xf32> -> vector<32x128xf32>
    %c0_17 = arith.constant 0 : index
    %c0_18 = arith.constant 0 : index
    %51 = vector.load %arg3[%c0_17, %c0_18] : memref<1x128xf32, #tpu.memory_space<vmem>>, vector<1x128xf32>
    %52 = vector.broadcast %51 : vector<1x128xf32> to vector<32x128xf32>
    %53 = arith.addf %50, %52 : vector<32x128xf32>
    %cst_19 = arith.constant 0.000000e+00 : f32
    %54 = vector.broadcast %cst_19 : f32 to vector<32x128xf32>
    %55 = arith.maximumf %53, %54 : vector<32x128xf32>
    %56 = arith.truncf %55 : vector<32x128xf32> to vector<32x128xbf16>
    %c0_20 = arith.constant 0 : index
    %c0_21 = arith.constant 0 : index
    %57 = vector.load %arg4[%c0_20, %c0_21] : memref<128x128xbf16, #tpu.memory_space<vmem>>, vector<128x128xbf16>
    %cst_22 = arith.constant dense<0.000000e+00> : vector<32x128xf32>
    %58 = tpu.matmul %56, %57, %cst_22 {dimension_numbers = #tpu.dot_dimension_numbers<[1], [0], [0], [1], [0, 0, 1, 1], [], []>} : vector<32x128xbf16>, vector<128x128xbf16>, vector<32x128xf32> -> vector<32x128xf32>
    %c0_23 = arith.constant 0 : index
    %c0_24 = arith.constant 0 : index
    %59 = vector.load %arg5[%c0_23, %c0_24] : memref<1x128xf32, #tpu.memory_space<vmem>>, vector<1x128xf32>
    %60 = vector.broadcast %59 : vector<1x128xf32> to vector<32x128xf32>
    %61 = arith.addf %58, %60 : vector<32x128xf32>
    %cst_25 = arith.constant 0.000000e+00 : f32
    %62 = vector.broadcast %cst_25 : f32 to vector<32x128xf32>
    %63 = arith.maximumf %61, %62 : vector<32x128xf32>
    %c2_i32 = arith.constant 2 : i32
    %64 = tpu.dynamic_rotate %63 by %c2_i32 dim 0 : vector<32x128xf32>, i32 -> vector<32x128xf32>
    %c-2_i32 = arith.constant -2 : i32
    %65 = vector.broadcast %c-2_i32 : i32 to vector<32x1xi32>
    %66 = arith.addi %18, %65 : vector<32x1xi32>
    %c0_i32_26 = arith.constant 0 : i32
    %67 = vector.broadcast %c0_i32_26 : i32 to vector<32x1xi32>
    %68 = arith.cmpi sge, %66, %67 : vector<32x1xi32>
    %c-2_i32_27 = arith.constant -2 : i32
    %69 = vector.broadcast %c-2_i32_27 : i32 to vector<32x1xi32>
    %70 = arith.addi %18, %69 : vector<32x1xi32>
    %c16_i32_28 = arith.constant 16 : i32
    %71 = vector.broadcast %c16_i32_28 : i32 to vector<32x1xi32>
    %72 = arith.cmpi slt, %70, %71 : vector<32x1xi32>
    %73 = arith.andi %68, %72 : vector<32x1xi1>
    %cst_29 = arith.constant 0.000000e+00 : f32
    %74 = vector.shape_cast %73 : vector<32x1xi1> to vector<32x1xi1>
    %75 = vector.broadcast %74 : vector<32x1xi1> to vector<32x128xi1>
    %76 = vector.broadcast %cst_29 : f32 to vector<32x128xf32>
    %77 = arith.select %75, %64, %76 : vector<32x128xi1>, vector<32x128xf32>
    %c30_i32 = arith.constant 30 : i32
    %78 = tpu.dynamic_rotate %63 by %c30_i32 dim 0 : vector<32x128xf32>, i32 -> vector<32x128xf32>
    %c2_i32_30 = arith.constant 2 : i32
    %79 = vector.broadcast %c2_i32_30 : i32 to vector<32x1xi32>
    %80 = arith.addi %18, %79 : vector<32x1xi32>
    %c0_i32_31 = arith.constant 0 : i32
    %81 = vector.broadcast %c0_i32_31 : i32 to vector<32x1xi32>
    %82 = arith.cmpi sge, %80, %81 : vector<32x1xi32>
    %c2_i32_32 = arith.constant 2 : i32
    %83 = vector.broadcast %c2_i32_32 : i32 to vector<32x1xi32>
    %84 = arith.addi %18, %83 : vector<32x1xi32>
    %c16_i32_33 = arith.constant 16 : i32
    %85 = vector.broadcast %c16_i32_33 : i32 to vector<32x1xi32>
    %86 = arith.cmpi slt, %84, %85 : vector<32x1xi32>
    %87 = arith.andi %82, %86 : vector<32x1xi1>
    %cst_34 = arith.constant 0.000000e+00 : f32
    %88 = vector.shape_cast %87 : vector<32x1xi1> to vector<32x1xi1>
    %89 = vector.broadcast %88 : vector<32x1xi1> to vector<32x128xi1>
    %90 = vector.broadcast %cst_34 : f32 to vector<32x128xf32>
    %91 = arith.select %89, %78, %90 : vector<32x128xi1>, vector<32x128xf32>
    %92 = tpu.concatenate %77, %63, %91 in 1 : vector<32x128xf32>, vector<32x128xf32>, vector<32x128xf32> -> vector<32x384xf32>
    %93 = arith.truncf %92 : vector<32x384xf32> to vector<32x384xbf16>
    %c0_35 = arith.constant 0 : index
    %c0_36 = arith.constant 0 : index
    %94 = vector.load %arg6[%c0_35, %c0_36] : memref<384x128xbf16, #tpu.memory_space<vmem>>, vector<384x128xbf16>
    %cst_37 = arith.constant dense<0.000000e+00> : vector<32x128xf32>
    %95 = tpu.matmul %93, %94, %cst_37 {dimension_numbers = #tpu.dot_dimension_numbers<[1], [0], [0], [1], [0, 0, 1, 1], [], []>} : vector<32x384xbf16>, vector<384x128xbf16>, vector<32x128xf32> -> vector<32x128xf32>
    %c0_38 = arith.constant 0 : index
    %c0_39 = arith.constant 0 : index
    %96 = vector.load %arg7[%c0_38, %c0_39] : memref<1x128xf32, #tpu.memory_space<vmem>>, vector<1x128xf32>
    %97 = vector.broadcast %96 : vector<1x128xf32> to vector<32x128xf32>
    %98 = arith.addf %95, %97 : vector<32x128xf32>
    %cst_40 = arith.constant 0.000000e+00 : f32
    %99 = vector.broadcast %cst_40 : f32 to vector<32x128xf32>
    %100 = arith.maximumf %98, %99 : vector<32x128xf32>
    %101 = arith.truncf %100 : vector<32x128xf32> to vector<32x128xbf16>
    %c0_41 = arith.constant 0 : index
    %c0_42 = arith.constant 0 : index
    %102 = vector.load %arg8[%c0_41, %c0_42] : memref<128x128xbf16, #tpu.memory_space<vmem>>, vector<128x128xbf16>
    %cst_43 = arith.constant dense<0.000000e+00> : vector<32x128xf32>
    %103 = tpu.matmul %101, %102, %cst_43 {dimension_numbers = #tpu.dot_dimension_numbers<[1], [0], [0], [1], [0, 0, 1, 1], [], []>} : vector<32x128xbf16>, vector<128x128xbf16>, vector<32x128xf32> -> vector<32x128xf32>
    %c0_44 = arith.constant 0 : index
    %c0_45 = arith.constant 0 : index
    %104 = vector.load %arg9[%c0_44, %c0_45] : memref<1x128xf32, #tpu.memory_space<vmem>>, vector<1x128xf32>
    %105 = vector.broadcast %104 : vector<1x128xf32> to vector<32x128xf32>
    %106 = arith.addf %103, %105 : vector<32x128xf32>
    %107 = arith.addf %106, %1 : vector<32x128xf32>
    %cst_46 = arith.constant 0.000000e+00 : f32
    %108 = vector.broadcast %cst_46 : f32 to vector<32x128xf32>
    %109 = arith.maximumf %107, %108 : vector<32x128xf32>
    %110 = vector.shape_cast %109 : vector<32x128xf32> to vector<2x16x128xf32>
    %c0_47 = arith.constant 0 : index
    %c0_48 = arith.constant 0 : index
    %c0_49 = arith.constant 0 : index
    %111 = vector.load %arg10[%c0_47, %c0_48, %c0_49] : memref<2x16x128xf32, #tpu.memory_space<vmem>>, vector<2x16x128xf32>
    tpu.vector_store %arg10[%c0_47, %c0_48, %c0_49], %110 {strides = array<i32>} : memref<2x16x128xf32, #tpu.memory_space<vmem>>, vector<2x16x128xf32>,
    return
  }
  func.func @transform_0(%arg0: i32) -> (i32, i32, i32) {
    %c0_i32 = arith.constant 0 : i32
    %c0_i32_0 = arith.constant 0 : i32
    %c0_i32_1 = arith.constant 0 : i32
    return %arg0, %c0_i32, %c0_i32_0 : i32, i32, i32
  }
  func.func @transform_1(%arg0: i32) -> (i32, i32) {
    %c0_i32 = arith.constant 0 : i32
    %c0_i32_0 = arith.constant 0 : i32
    %c0_i32_1 = arith.constant 0 : i32
    return %c0_i32, %c0_i32_0 : i32, i32
  }
  func.func @transform_2(%arg0: i32) -> (i32, i32) {
    %c0_i32 = arith.constant 0 : i32
    %c0_i32_0 = arith.constant 0 : i32
    %c0_i32_1 = arith.constant 0 : i32
    return %c0_i32, %c0_i32_0 : i32, i32
  }
  func.func @transform_3(%arg0: i32) -> (i32, i32) {
    %c0_i32 = arith.constant 0 : i32
    %c0_i32_0 = arith.constant 0 : i32
    %c0_i32_1 = arith.constant 0 : i32
    return %c0_i32, %c0_i32_0 : i32, i32
  }
  func.func @transform_4(%arg0: i32) -> (i32, i32) {
    %c0_i32 = arith.constant 0 : i32
    %c0_i32_0 = arith.constant 0 : i32
    %c0_i32_1 = arith.constant 0 : i32
    return %c0_i32, %c0_i32_0 : i32, i32
  }
  func.func @transform_5(%arg0: i32) -> (i32, i32) {
    %c0_i32 = arith.constant 0 : i32
    %c0_i32_0 = arith.constant 0 : i32
    %c0_i32_1 = arith.constant 0 : i32
    return %c0_i32, %c0_i32_0 : i32, i32
  }
  func.func @transform_6(%arg0: i32) -> (i32, i32) {
    %c0_i32 = arith.constant 0 : i32
    %c0_i32_0 = arith.constant 0 : i32
    %c0_i32_1 = arith.constant 0 : i32
    return %c0_i32, %c0_i32_0 : i32, i32
  }
  func.func @transform_7(%arg0: i32) -> (i32, i32) {
    %c0_i32 = arith.constant 0 : i32
    %c0_i32_0 = arith.constant 0 : i32
    %c0_i32_1 = arith.constant 0 : i32
    return %c0_i32, %c0_i32_0 : i32, i32
  }
  func.func @transform_8(%arg0: i32) -> (i32, i32) {
    %c0_i32 = arith.constant 0 : i32
    %c0_i32_0 = arith.constant 0 : i32
    %c0_i32_1 = arith.constant 0 : i32
    return %c0_i32, %c0_i32_0 : i32, i32
  }
  func.func @transform_9(%arg0: i32) -> (i32, i32, i32) {
    %c0_i32 = arith.constant 0 : i32
    %c0_i32_0 = arith.constant 0 : i32
    %c0_i32_1 = arith.constant 0 : i32
    return %arg0, %c0_i32, %c0_i32_0 : i32, i32, i32
  }
}

</mosaic_0001>

<bundles_post_ra>
// kernel: tpu_custom_call.1
= control target key start
LH: loop header
LB: loop body
LE: loop exit
PB: predicated region body
PF: predicated region fallthrough
CT: control target
= control target key end

     0   :  { %14 = vsyncpa [#allocation3], 0  ;;  %s1776_s0 = inlined_call_operand.hbm [shape: f32[2,16,128], index: 0, kind: input, shape index: {}]   ;;  %s1777_s1 = inlined_call_operand.hbm [shape: bf16[384,128], index: 1, kind: input, shape index: {}]   ;;  %s1778_s2 = inlined_call_operand.vmem [shape: f32[1,128], index: 2, kind: input, shape index: {}]   ;;  %s1779_s3 = inlined_call_operand.hbm [shape: bf16[128,128], index: 3, kind: input, shape index: {}]   ;;  %s1780_s4 = inlined_call_operand.vmem [shape: f32[1,128], index: 4, kind: input, shape index: {}]   ;;  %s1781_s5 = inlined_call_operand.hbm [shape: bf16[384,128], index: 5, kind: input, shape index: {}]   ;;  %s1782_s6 = inlined_call_operand.vmem [shape: f32[1,128], index: 6, kind: input, shape index: {}]   ;;  %s1783_s7 = inlined_call_operand.hbm [shape: bf16[128,128], index: 7, kind: input, shape index: {}]   ;;  %s1784_s8 = inlined_call_operand.vmem [shape: f32[1,128], index: 8, kind: input, shape index: {}]   ;;  %s1785_s9 = inlined_call_operand.hbm [shape: f32[2,16,128], index: 9, kind: output, shape index: {}]  }
   0x1   :  { %15 = vsyncpa [#allocation6], 0 }
   0x2   :  { %16 = vsyncpa [#allocation9], 0  ;;  %s35_s11 = sshll.u32 %s1777_s1, 4  ;;  %s36_s11 = int_to_ptr.hbm [resolvable:$true] %s35_s11 }
   0x3   :  { %17 = vsyncpa [#allocation4], 0  ;;  %s1568_s12 = smov [#allocation5]   ;;  %s65_s16 = sshll.u32 %s1781_s5, 4  ;;  %s66_s16 = int_to_ptr.hbm [resolvable:$true] %s65_s16 }
   0x4   :  { %s37_s13 = sshll.u32 %s1568_s12, 4  ;;  %s1569_s17 = smov 64   ;;  %s38_s13 = int_to_ptr.vmem [resolvable:$true] %s37_s13 }
   0x5   :  { %s1570_s18 = smov 4   ;;  %s1571_s19 = smov [#allocation8]  }
   0x6   :  { %43 = dma.hbm_to_vmem [thread:$0]  %s36_s11, 3072, %s38_s13, [#allocation6], %s1569_s17, %s1569_s17, %s1570_s18  }
   0x7   :  { %s67_s20 = sshll.u32 %s1571_s19, 4  ;;  %s22_s22 = sshll.u32 %s1776_s0, 4  ;;  %s68_s20 = int_to_ptr.vmem [resolvable:$true] %s67_s20  ;;  %s23_s22 = int_to_ptr.hbm [resolvable:$true] %s22_s22 }
   0x8   :  { %73 = dma.hbm_to_vmem [thread:$0]  %s66_s16, 3072, %s68_s20, [#allocation9], %s1569_s17, %s1569_s17, %s1570_s18  }
   0x9   :  { %s1572_s5 = smov [#allocation2]   ;;  %s50_s26 = sshll.u32 %s1779_s3, 4  ;;  %s51_s26 = int_to_ptr.hbm [resolvable:$true] %s50_s26 }
   0xa   :  { %s24_s23 = sshll.u32 %s1572_s5, 4  ;;  %s1573_s27 = smov 128   ;;  %s25_s23 = int_to_ptr.vmem [resolvable:$true] %s24_s23 }
   0xb   :  { %s1574_s28 = smov 8   ;;  %s1575_s0 = smov [#allocation7]  }
   0xc   :  { %30 = dma.hbm_to_vmem [thread:$0]  %s23_s22, 512, %s25_s23, [#allocation3], %s1573_s27, %s1573_s27, %s1574_s28  }
   0xd   :  { %s52_s29 = sshll.u32 %s1575_s0, 4  ;;  %s80_s11 = sshll.u32 %s1783_s7, 4  ;;  %s53_s29 = int_to_ptr.vmem [resolvable:$true] %s52_s29  ;;  %s81_s11 = int_to_ptr.hbm [resolvable:$true] %s80_s11 }
   0xe   :  { %58 = dma.hbm_to_vmem [thread:$0]  %s51_s26, 1024, %s53_s29, [#allocation6], %s1569_s17, %s1569_s17, %s1570_s18  }
   0xf   :  { %s1576_s3 = smov [#allocation10]  }
  0x10   :  { %s82_s12 = sshll.u32 %s1576_s3, 4  ;;  %s83_s12 = int_to_ptr.vmem [resolvable:$true] %s82_s12 }
  0x11   :  { %88 = dma.hbm_to_vmem [thread:$0]  %s81_s11, 1024, %s83_s12, [#allocation9], %s1569_s17, %s1569_s17, %s1570_s18  }
  0x12   :  { %1560 = dma.done.wait [#allocation3], 512  }
  0x13   :  { %1561 = vsyncadd [#allocation3], 4294966784 }
  0x14   :  { %1562 = dma.done.wait [#allocation6], 4096  }
  0x15   :  { %1563 = vsyncadd [#allocation6], 4294963200 }
  0x16   :  { %1564 = dma.done.wait [#allocation9], 4096  }
  0x17   :  { %1565 = vsyncadd [#allocation9], 4294963200  ;;  %v1344_v0 = vld [vmem:[#allocation5 + $0x38] sm:$0xff]  ;;  %v1343_v3 = vld [vmem:[#allocation5 + $0x30] sm:$0xff]  ;;  %v115_v9 = vlaneseq  ;;  %vm1577_vm4 = vmmov 1   ;;  %s1042_s20 = sshll.u32 %s1785_s9, 4  ;;  %s1043_s20 = int_to_ptr.hbm [resolvable:$true] %s1042_s20 }
  0x18   :  { %v1352_v1 = vld [vmem:[#allocation5 + $0x78] sm:$0xff]  ;;  %444 = vmatpush.bf16.msra.mxu0 %v1344_v0  ;;  %v1351_v4 = vld [vmem:[#allocation5 + $0x70] sm:$0xff]  ;;  %v1342_v6 = vld [vmem:[#allocation5 + $0x28] sm:$0xff] }
  0x19   :  { %v1360_v2 = vld [vmem:[#allocation5 + $0xb8] sm:$0xff]  ;;  %463 = vmatpush.bf16.msra.mxu1 %v1352_v1  ;;  %v1359_v5 = vld [vmem:[#allocation5 + $0xb0] sm:$0xff]  ;;  %v1350_v7 = vld [vmem:[#allocation5 + $0x68] sm:$0xff]  ;;  %v1659_v13 = vshrl.u32 %v115_v9, 7 }
  0x1a   :  { %482 = vmatpush.bf16.msra.mxu2 %v1360_v2  ;;  %v1358_v8 = vld [vmem:[#allocation5 + $0xa8] sm:$0xff]  ;;  %v1341_v10 = vld [vmem:[#allocation5 + $0x20] sm:$0xff]  ;;  %v1340_v14 = vld [vmem:[#allocation5 + $0x18] sm:$0xff] }
  0x1b   :  { %v1349_v11 = vld [vmem:[#allocation5 + $0x60] sm:$0xff]  ;;  %v1348_v15 = vld [vmem:[#allocation5 + $0x58] sm:$0xff]  ;;  %v1662_v17 = vadd.s32 8, %v1659_v13  ;;  %v1339_v18 = vld [vmem:[#allocation5 + $0x10] sm:$0xff]  ;;  %v124_v25 = vand.u32 15, %v1659_v13  ;;  %vm172_vm0 = vcmp.lt.s32.totalorder %v1659_v13, 1 }
  0x1c   :  { %445 = vmatpush.bf16.msra.mxu0 %v1343_v3  ;;  %v1357_v12 = vld [vmem:[#allocation5 + $0xa0] sm:$0xff]  ;;  %v1356_v16 = vld [vmem:[#allocation5 + $0x98] sm:$0xff]  ;;  %v1347_v19 = vld [vmem:[#allocation5 + $0x50] sm:$0xff]  ;;  %vm209_vm1 = vcmp.lt.s32.totalorder %v1659_v13, 7  ;;  %v1699_v51 = vadd.s32 16, %v1659_v13  ;;  %v1702_v52 = vadd.s32 24, %v1659_v13 }
  0x1d   :  { %464 = vmatpush.bf16.msra.mxu1 %v1351_v4  ;;  %v1355_v20 = vld [vmem:[#allocation5 + $0x90] sm:$0xff]  ;;  %v1368_v21 = vld [vmem:[#allocation7 + $0x38] sm:$0xff]  ;;  %v1664_v22 = vld [vmem:[#allocation2] sm:$0xff]  ;;  %v131_v27 = vand.u32 15, %v1662_v17  ;;  %v177_v35 = vadd.s32 4294967295, %v124_v25  ;;  %vm639_vm11 = vcmp.lt.s32.totalorder %v1659_v13, 6 }
  0x1e   :  { %483 = vmatpush.bf16.msra.mxu2 %v1359_v5  ;;  %v1666_v23 = vld [vmem:[#allocation2 + $0x8] sm:$0xff]  ;;  %v1668_v24 = vld [vmem:[#allocation2 + $0x18] sm:$0xff]  ;;  %v1671_v26 = vld [vmem:[#allocation2 + $0x10] sm:$0xff]  ;;  %575 = vmatpush.bf16.msra.mxu3 %v1368_v21  ;;  %v168_v31 = vrot.slane %v1664_v22, 7  ;;  %v205_v36 = vrot.slane %v1664_v22, 1  ;;  %v138_v53 = vand.u32 15, %v1699_v51 }
  0x1f   :  { %v1367_v28 = vld [vmem:[#allocation7 + $0x30] sm:$0xff]  ;;  %v1338_v29 = vld [vmem:[#allocation5 + $0x8] sm:$0xff]  ;;  %v169_v32 = vrot.slane %v1666_v23, 7  ;;  %v171_v33 = vrot.slane %v1668_v24, 7  ;;  %v206_v37 = vrot.slane %v1666_v23, 1  ;;  %v207_v38 = vrot.slane %v1671_v26, 1 }
  0x20   :  { %446 = vmatpush.bf16.msra.mxu0 %v1342_v6  ;;  %v1346_v30 = vld [vmem:[#allocation5 + $0x48] sm:$0xff]  ;;  %v215_v39 = vadd.s32 1, %v131_v27  ;;  %v1337_v41 = vld [vmem:[#allocation5] sm:$0xff]  ;;  %vm181_vm2 = vcmp.ge.s32.totalorder %v177_v35, 0  ;;  %v243_v49 = vpack.c.bf16 %v1666_v23, %v1664_v22  ;;  %v145_v54 = vand.u32 15, %v1702_v52  ;;  %v1364_v3 = vld [vmem:[#allocation7 + $0x18] sm:$0xff] }
  0x21   :  { %465 = vmatpush.bf16.msra.mxu1 %v1350_v7  ;;  %v1354_v34 = vld [vmem:[#allocation5 + $0x88] sm:$0xff]  ;;  %v1345_v42 = vld [vmem:[#allocation5 + $0x40] sm:$0xff]  ;;  %v175_v43 = vsel %vm172_vm0, %v168_v31, %v169_v32  ;;  %v176_v44 = vsel %vm172_vm0, %v171_v33, %v168_v31  ;;  %v211_v46 = vsel %vm209_vm1, %v206_v37, %v207_v38  ;;  %v212_v47 = vsel %vm209_vm1, %v205_v36, %v206_v37  ;;  %vm1153_vm5 = vmpackc.low %vm1577_vm4, %vm181_vm2 }
  0x22   :  { %484 = vmatpush.bf16.msra.mxu2 %v1358_v8  ;;  %576 = vmatpush.bf16.msra.mxu3 %v1367_v28  ;;  %v1366_v40 = vld [vmem:[#allocation7 + $0x28] sm:$0xff]  ;;  %v1353_v45 = vld [vmem:[#allocation5 + $0x80] sm:$0xff]  ;;  %vm223_vm3 = vcmp.lt.s32.totalorder %v215_v39, 16  ;;  %v1154_v48 = vpack.c.bf16 %v175_v43, %v176_v44  ;;  %v1160_v50 = vpack.c.bf16 %v211_v46, %v212_v47  ;;  %v170_v55 = vrot.slane %v1671_v26, 7  ;;  %v1363_v4 = vld [vmem:[#allocation7 + $0x10] sm:$0xff] }
  0x23   :  { %vm1159_vm6 = vmpackc.low %vm223_vm3, %vm1577_vm4  ;;  %v179_v56 = vadd.s32 4294967295, %v138_v53  ;;  %v208_v57 = vrot.slane %v1668_v24, 1  ;;  %v217_v58 = vadd.s32 1, %v145_v54  ;;  %v246_v0 = vpack.c.bf16 %v1668_v24, %v1671_v26  ;;  %v1365_v2 = vld [vmem:[#allocation7 + $0x20] sm:$0xff]  ;;  %v1362_v5 = vld [vmem:[#allocation7 + $0x8] sm:$0xff] }
  0x24   :  { %447 = vmatpush.bf16.msra.mxu0 %v1341_v10  ;;  %v173_v59 = vsel %vm172_vm0, %v170_v55, %v171_v33  ;;  %v174_v60 = vsel %vm172_vm0, %v169_v32, %v170_v55  ;;  %v1361_v6 = vld [vmem:[#allocation7] sm:$0xff]  ;;  %v1382_v28 = vld [vmem:[#allocation8 + $0x68] sm:$0xff]  ;;  %v607_v17 = vadd.s32 4294967294, %v124_v25  ;;  %vm602_vm14 = vcmp.lt.s32.totalorder %v1659_v13, 2 }
  0x25   :  { %466 = vmatpush.bf16.msra.mxu1 %v1349_v11  ;;  %vm183_vm7 = vcmp.ge.s32.totalorder %v179_v56, 0  ;;  %v210_v61 = vsel %vm209_vm1, %v207_v38, %v208_v57  ;;  %v213_v62 = vsel %vm209_vm1, %v208_v57, %v205_v36  ;;  %vm225_vm8 = vcmp.lt.s32.totalorder %v217_v58, 16  ;;  %v1412_v9 = vld [vmem:[%s1778_s2] ss:$0 sm:$0xff]  ;;  %v1384_v11 = vld [vmem:[#allocation8 + $0x78] sm:$0xff]  ;;  %v1390_v58 = vld [vmem:[#allocation8 + $0xa8] sm:$0xff] }
  0x26   :  { %485 = vmatpush.bf16.msra.mxu2 %v1357_v12  ;;  %577 = vmatpush.bf16.msra.mxu3 %v1366_v40  ;;  %v1157_v63 = vpack.c.bf16 %v173_v59, %v174_v60  ;;  %vm1156_vm9 = vmpackc.low %vm1577_vm4, %vm183_vm7  ;;  %v1163_v1 = vpack.c.bf16 %v213_v62, %v210_v61  ;;  %v1380_v56 = vld [vmem:[#allocation8 + $0x58] sm:$0xff]  ;;  %v1379_v59 = vld [vmem:[#allocation8 + $0x50] sm:$0xff]  ;;  %vm611_vm15 = vcmp.ge.s32.totalorder %v607_v17, 0 }
  0x27   :  { %vm1162_vm10 = vmpackc.low %vm225_vm8, %vm1577_vm4  ;;  %v1376_v57 = vld [vmem:[#allocation8 + $0x38] sm:$0xff]  ;;  %v1375_v60 = vld [vmem:[#allocation8 + $0x30] sm:$0xff] }
  0x28   :  { %448 = vmatpush.bf16.msra.mxu0 %v1340_v14  ;;  %v1392_v14 = vld [vmem:[#allocation8 + $0xb8] sm:$0xff]  ;;  %v1389_v61 = vld [vmem:[#allocation8 + $0xa0] sm:$0xff]  ;;  %v1378_v62 = vld [vmem:[#allocation8 + $0x48] sm:$0xff] }
  0x29   :  { %467 = vmatpush.bf16.msra.mxu1 %v1348_v15  ;;  %vm1293_vm0 = vmpackc.low %vm1577_vm4, %vm611_vm15  ;;  %v1397_v51 = vld [vmem:[#allocation10 + $0x20] sm:$0xff] }
  0x2a   :  { %486 = vmatpush.bf16.msra.mxu2 %v1356_v16  ;;  %578 = vmatpush.bf16.msra.mxu3 %v1365_v2  ;;  %v1383_v16 = vld [vmem:[#allocation8 + $0x70] sm:$0xff]  ;;  %v1373_v2 = vld [vmem:[#allocation8 + $0x20] sm:$0xff] }
  0x2b   :  { %v1393_v13 = vld [vmem:[#allocation10] sm:$0xff] }
  0x2c   :  { %449 = vmatpush.bf16.msra.mxu0 %v1339_v18 }
  0x2d   :  { %468 = vmatpush.bf16.msra.mxu1 %v1347_v19  ;;  %v1391_v19 = vld [vmem:[#allocation8 + $0xb0] sm:$0xff] }
  0x2e   :  { %487 = vmatpush.bf16.msra.mxu2 %v1355_v20  ;;  %579 = vmatpush.bf16.msra.mxu3 %v1364_v3  ;;  %v1387_v3 = vld [vmem:[#allocation8 + $0x90] sm:$0xff] }
  0x30   :  { %450 = vmatpush.bf16.msra.mxu0 %v1338_v29 }
  0x31   :  { %469 = vmatpush.bf16.msra.mxu1 %v1346_v30 }
  0x32   :  { %488 = vmatpush.bf16.msra.mxu2 %v1354_v34  ;;  %580 = vmatpush.bf16.msra.mxu3 %v1363_v4  ;;  %v1381_v34 = vld [vmem:[#allocation8 + $0x60] sm:$0xff]  ;;  %v1372_v4 = vld [vmem:[#allocation8 + $0x18] sm:$0xff] }
  0x34   :  { %451 = vmatpush.bf16.msra.mxu0 %v1337_v41 }
  0x35   :  { %470 = vmatpush.bf16.msra.mxu1 %v1345_v42 }
  0x36   :  { %489 = vmatpush.bf16.msra.mxu2 %v1353_v45  ;;  %581 = vmatpush.bf16.msra.mxu3 %v1362_v5  ;;  %v1386_v5 = vld [vmem:[#allocation8 + $0x88] sm:$0xff] }
  0x37   :  { %1155 = vmatmul.msk.bf16.vlgmr.msra.gmra.mxu0 %vm1153_vm5, %v1154_v48 }
  0x38   :  { %471 = vmatmul.bf16.vlgmr.msra.gmra.mxu1 %v243_v49  ;;  %874 = vmatpush.bf16.msrb.mxu0 %v1376_v57  ;;  %v1399_v57 = vld [vmem:[#allocation10 + $0x30] sm:$0xff] }
  0x39   :  { %1161 = vmatmul.msk.bf16.vlgmr.msra.gmra.mxu2 %vm1159_vm6, %v1160_v50  ;;  %893 = vmatpush.bf16.msrb.mxu1 %v1384_v11  ;;  %v1413_v11 = vld [vmem:[%s1780_s4] ss:$0 sm:$0xff] }
  0x3a   :  { %582 = vmatpush.bf16.msra.mxu3 %v1361_v6  ;;  %912 = vmatpush.bf16.msrb.mxu2 %v1392_v14  ;;  %v1371_v6 = vld [vmem:[#allocation8 + $0x10] sm:$0xff] }
  0x3c   :  { %875 = vmatpush.bf16.msrb.mxu0 %v1375_v60  ;;  %v1394_v60 = vld [vmem:[#allocation10 + $0x8] sm:$0xff] }
  0x3d   :  { %894 = vmatpush.bf16.msrb.mxu1 %v1383_v16 }
  0x3e   :  { %913 = vmatpush.bf16.msrb.mxu2 %v1391_v19 }
  0x41   :  { %895 = vmatpush.bf16.msrb.mxu1 %v1382_v28 }
  0x42   :  { %914 = vmatpush.bf16.msrb.mxu2 %v1390_v58  ;;  %v1398_v58 = vld [vmem:[#allocation10 + $0x28] sm:$0xff] }
  0x45   :  { %896 = vmatpush.bf16.msrb.mxu1 %v1381_v34 }
  0x46   :  { %915 = vmatpush.bf16.msrb.mxu2 %v1389_v61 }
  0x47   :  { %1158 = vmatmul.msk.bf16.gmra.mxu0 %vm1156_vm9, %v1157_v63  ;;  %v1374_v63 = vld [vmem:[#allocation8 + $0x28] sm:$0xff] }
  0x48   :  { %476 = vmatmul.bf16.gmra.mxu1 %v246_v0  ;;  %v1388_v0 = vld [vmem:[#allocation8 + $0x98] sm:$0xff]  ;;  %876 = vmatpush.bf16.msrb.mxu0 %v1374_v63  ;;  %v1414_v63 = vld [vmem:[%s1782_s6] ss:$0 sm:$0xff] }
  0x49   :  { %1164 = vmatmul.msk.bf16.gmra.mxu2 %vm1162_vm10, %v1163_v1  ;;  %897 = vmatpush.bf16.msrb.mxu1 %v1380_v56  ;;  %v1377_v1 = vld [vmem:[#allocation8 + $0x40] sm:$0xff]  ;;  %v1400_v56 = vld [vmem:[#allocation10 + $0x38] sm:$0xff] }
  0x4a   :  { %916 = vmatpush.bf16.msrb.mxu2 %v1388_v0  ;;  %1005 = vmatpush.bf16.msrb.mxu3 %v1400_v56 }
  0x4c   :  { %877 = vmatpush.bf16.msrb.mxu0 %v1373_v2 }
  0x4d   :  { %898 = vmatpush.bf16.msrb.mxu1 %v1379_v59  ;;  %v1395_v59 = vld [vmem:[#allocation10 + $0x10] sm:$0xff] }
  0x4e   :  { %917 = vmatpush.bf16.msrb.mxu2 %v1387_v3  ;;  %1006 = vmatpush.bf16.msrb.mxu3 %v1399_v57 }
  0x50   :  { %878 = vmatpush.bf16.msrb.mxu0 %v1372_v4 }
  0x51   :  { %899 = vmatpush.bf16.msrb.mxu1 %v1378_v62 }
  0x52   :  { %918 = vmatpush.bf16.msrb.mxu2 %v1386_v5  ;;  %1007 = vmatpush.bf16.msrb.mxu3 %v1398_v58 }
  0x54   :  { %879 = vmatpush.bf16.msrb.mxu0 %v1371_v6 }
  0x55   :  { %900 = vmatpush.bf16.msrb.mxu1 %v1377_v1 }
  0x56   :  { %1008 = vmatpush.bf16.msrb.mxu3 %v1397_v51 }
  0xb4   :  { %v453_v7 = vpop.f32.mrf.mxu0 }
  0xb5   :  { %v472_v8 = vpop.f32.mrf.mxu1  ;;  %v454_v10 = vadd.f32 %v1412_v9, %v453_v7  ;;  %v1385_v7 = vld [vmem:[#allocation8 + $0x80] sm:$0xff] }
  0xb6   :  { %919 = vmatpush.bf16.msrb.mxu2 %v1385_v7 }
  0xb7   :  { %v473_v20 = vadd.f32 %v472_v8, %v454_v10  ;;  %v1370_v8 = vld [vmem:[#allocation8 + $0x8] sm:$0xff] }
  0xb8   :  { %880 = vmatpush.bf16.msrb.mxu0 %v1370_v8 }
  0xbc   :  { %v491_v12 = vpop.f32.mrf.mxu2  ;;  %v455_v15 = vpop.f32.mrf.mxu0 }
  0xbd   :  { %v474_v18 = vpop.f32.mrf.mxu1  ;;  %v456_v21 = vadd.f32 %v1412_v9, %v455_v15  ;;  %v492_v29 = vadd.f32 %v491_v12, %v473_v20 }
  0xbf   :  { %v475_v30 = vadd.f32 %v474_v18, %v456_v21  ;;  %v501_v35 = vmax.f32 %v492_v29, 0.0  ;;  %v645_v21 = vadd.s32 2, %v131_v27 }
  0xc1   :  { %vm653_vm12 = vcmp.lt.s32.totalorder %v645_v21, 16 }
  0xc2   :  { %vm1299_vm13 = vmpackc.low %vm653_vm12, %vm1577_vm4 }
  0xc4   :  { %v493_v31 = vpop.f32.mrf.mxu2  ;;  %v458_v33 = vpop.f32.mrf.mxu0 }
  0xc5   :  { %v494_v32 = vadd.f32 %v493_v31, %v475_v30  ;;  %v477_v37 = vpop.f32.mrf.mxu1  ;;  %v459_v39 = vadd.f32 %v1412_v9, %v458_v33 }
  0xc7   :  { %v502_v36 = vmax.f32 %v494_v32, 0.0  ;;  %v478_v42 = vadd.f32 %v477_v37, %v459_v39 }
  0xc9   :  { %v505_v38 = vpack.c.bf16 %v502_v36, %v501_v35 }
  0xcb   :  { %583 = vmatmul.bf16.vlgmr.msra.gmra.mxu3 %v505_v38 }
  0xcc   :  { %v496_v40 = vpop.f32.mrf.mxu2  ;;  %v460_v41 = vpop.f32.mrf.mxu0 }
  0xcd   :  { %v461_v43 = vadd.f32 %v1412_v9, %v460_v41  ;;  %v479_v44 = vpop.f32.mrf.mxu1  ;;  %v497_v45 = vadd.f32 %v496_v40, %v478_v42  ;;  %v1369_v9 = vld [vmem:[#allocation8] sm:$0xff] }
  0xce   :  { %881 = vmatpush.bf16.msrb.mxu0 %v1369_v9 }
  0xcf   :  { %v480_v46 = vadd.f32 %v479_v44, %v461_v43  ;;  %v503_v49 = vmax.f32 %v497_v45, 0.0  ;;  %v647_v44 = vadd.s32 2, %v145_v54 }
  0xd1   :  { %vm655_vm1 = vcmp.lt.s32.totalorder %v647_v44, 16 }
  0xd2   :  { %vm1302_vm2 = vmpackc.low %vm655_vm1, %vm1577_vm4 }
  0xd4   :  { %v498_v47 = vpop.f32.mrf.mxu2 }
  0xd5   :  { %v499_v48 = vadd.f32 %v498_v47, %v480_v46 }
  0xd7   :  { %v504_v50 = vmax.f32 %v499_v48, 0.0 }
  0xd9   :  { %v506_v55 = vpack.c.bf16 %v504_v50, %v503_v49  ;;  %v609_v49 = vadd.s32 4294967294, %v138_v53  ;;  %v1396_v53 = vld [vmem:[#allocation10 + $0x18] sm:$0xff] }
  0xda   :  { %1009 = vmatpush.bf16.msrb.mxu3 %v1396_v53 }
  0xdb   :  { %588 = vmatmul.bf16.gmra.mxu3 %v506_v55  ;;  %vm613_vm3 = vcmp.ge.s32.totalorder %v609_v49, 0 }
  0xdc   :  { %vm1296_vm5 = vmpackc.low %vm1577_vm4, %vm613_vm3 }
  0xde   :  { %1010 = vmatpush.bf16.msrb.mxu3 %v1395_v59 }
  0xe2   :  { %1011 = vmatpush.bf16.msrb.mxu3 %v1394_v60 }
  0xe6   :  { %1012 = vmatpush.bf16.msrb.mxu3 %v1393_v13 }
 0x14e   :  { %v584_v10 = vpop.f32.mrf.mxu3 }
 0x14f   :  { %v585_v12 = vadd.f32 %v1413_v11, %v584_v10 }
 0x151   :  { %v594_v16 = vmax.f32 %v585_v12, 0.0 }
 0x153   :  { %v635_v31 = vrot.slane %v594_v16, 2  ;;  %v598_v39 = vrot.slane %v594_v16, 6 }
 0x156   :  { %v586_v14 = vpop.f32.mrf.mxu3 }
 0x157   :  { %v587_v15 = vadd.f32 %v1413_v11, %v586_v14 }
 0x159   :  { %v595_v18 = vmax.f32 %v587_v15, 0.0 }
 0x15b   :  { %v673_v19 = vpack.c.bf16 %v595_v18, %v594_v16  ;;  %v636_v29 = vrot.slane %v595_v18, 2  ;;  %v599_v37 = vrot.slane %v595_v18, 6 }
 0x15d   :  { %901 = vmatmul.bf16.vlgmr.msrb.gmra.mxu1 %v673_v19  ;;  %v642_v34 = vsel %vm639_vm11, %v635_v31, %v636_v29  ;;  %v605_v42 = vsel %vm602_vm14, %v598_v39, %v599_v37 }
 0x15e   :  { %v589_v20 = vpop.f32.mrf.mxu3 }
 0x15f   :  { %v590_v28 = vadd.f32 %v1413_v11, %v589_v20 }
 0x161   :  { %v596_v30 = vmax.f32 %v590_v28, 0.0 }
 0x163   :  { %v637_v32 = vrot.slane %v596_v30, 2  ;;  %v600_v50 = vrot.slane %v596_v30, 6 }
 0x165   :  { %v641_v33 = vsel %vm639_vm11, %v636_v29, %v637_v32  ;;  %v604_v54 = vsel %vm602_vm14, %v599_v37, %v600_v50 }
 0x166   :  { %v591_v35 = vpop.f32.mrf.mxu3  ;;  %v1300_v36 = vpack.c.bf16 %v641_v33, %v642_v34 }
 0x167   :  { %v592_v27 = vadd.f32 %v1413_v11, %v591_v35 }
 0x168   :  { %1301 = vmatmul.msk.bf16.vlgmr.msrb.gmra.mxu2 %vm1299_vm13, %v1300_v36  ;;  %v1415_v36 = vld [vmem:[%s1784_s8] ss:$0 sm:$0xff]  ;;  %s1578_s8 = smov [#allocation11]  }
 0x169   :  { %v597_v38 = vmax.f32 %v592_v27, 0.0  ;;  %s1040_s17 = sshll.u32 %s1578_s8, 4  ;;  %s1041_s17 = int_to_ptr.vmem [resolvable:$true] %s1040_s17 }
 0x16b   :  { %v601_v40 = vrot.slane %v597_v38, 6  ;;  %v676_v41 = vpack.c.bf16 %v597_v38, %v596_v30  ;;  %v638_v45 = vrot.slane %v597_v38, 2 }
 0x16d   :  { %906 = vmatmul.bf16.gmra.mxu1 %v676_v41  ;;  %v606_v43 = vsel %vm602_vm14, %v601_v40, %v598_v39  ;;  %v640_v46 = vsel %vm639_vm11, %v637_v32, %v638_v45  ;;  %v643_v47 = vsel %vm639_vm11, %v638_v45, %v635_v31  ;;  %v603_v52 = vsel %vm602_vm14, %v600_v50, %v601_v40 }
 0x16e   :  { %v1294_v25 = vpack.c.bf16 %v605_v42, %v606_v43  ;;  %v1303_v48 = vpack.c.bf16 %v643_v47, %v640_v46  ;;  %v1297_v55 = vpack.c.bf16 %v603_v52, %v604_v54 }
 0x170   :  { %1295 = vmatmul.msk.bf16.vlgmr.msrb.gmra.mxu0 %vm1293_vm0, %v1294_v25 }
 0x178   :  { %1304 = vmatmul.msk.bf16.gmra.mxu2 %vm1302_vm2, %v1303_v48 }
 0x180   :  { %1298 = vmatmul.msk.bf16.gmra.mxu0 %vm1296_vm5, %v1297_v55 }
 0x1da   :  { %v902_v61 = vpop.f32.mrf.mxu1 }
 0x1e2   :  { %v904_v2 = vpop.f32.mrf.mxu1 }
 0x1ea   :  { %v907_v12 = vpop.f32.mrf.mxu1 }
 0x1eb   :  { %v921_v62 = vpop.f32.mrf.mxu2 }
 0x1ed   :  { %v883_v0 = vpop.f32.mrf.mxu0 }
 0x1ee   :  { %v884_v1 = vadd.f32 %v1414_v63, %v883_v0 }
 0x1f0   :  { %v903_v3 = vadd.f32 %v902_v61, %v884_v1 }
 0x1f2   :  { %v922_v7 = vadd.f32 %v921_v62, %v903_v3  ;;  %v909_v28 = vpop.f32.mrf.mxu1 }
 0x1f3   :  { %v923_v4 = vpop.f32.mrf.mxu2 }
 0x1f4   :  { %v931_v10 = vmax.f32 %v922_v7, 0.0 }
 0x1f5   :  { %v885_v5 = vpop.f32.mrf.mxu0 }
 0x1f6   :  { %v886_v6 = vadd.f32 %v1414_v63, %v885_v5 }
 0x1f8   :  { %v905_v8 = vadd.f32 %v904_v2, %v886_v6 }
 0x1fa   :  { %v924_v9 = vadd.f32 %v923_v4, %v905_v8 }
 0x1fb   :  { %v926_v16 = vpop.f32.mrf.mxu2 }
 0x1fc   :  { %v932_v11 = vmax.f32 %v924_v9, 0.0 }
 0x1fd   :  { %v888_v14 = vpop.f32.mrf.mxu0 }
 0x1fe   :  { %v935_v15 = vpack.c.bf16 %v932_v11, %v931_v10  ;;  %v889_v18 = vadd.f32 %v1414_v63, %v888_v14 }
 0x200   :  { %1013 = vmatmul.bf16.vlgmr.msrb.gmra.mxu3 %v935_v15  ;;  %v908_v19 = vadd.f32 %v907_v12, %v889_v18 }
 0x202   :  { %v927_v30 = vadd.f32 %v926_v16, %v908_v19 }
 0x203   :  { %v928_v31 = vpop.f32.mrf.mxu2 }
 0x204   :  { %v933_v33 = vmax.f32 %v927_v30, 0.0 }
 0x205   :  { %v890_v20 = vpop.f32.mrf.mxu0 }
 0x206   :  { %v891_v21 = vadd.f32 %v1414_v63, %v890_v20 }
 0x208   :  { %v910_v29 = vadd.f32 %v909_v28, %v891_v21 }
 0x20a   :  { %v929_v32 = vadd.f32 %v928_v31, %v910_v29 }
 0x20c   :  { %v934_v34 = vmax.f32 %v929_v32, 0.0 }
 0x20e   :  { %v936_v35 = vpack.c.bf16 %v934_v34, %v933_v33 }
 0x210   :  { %1018 = vmatmul.bf16.gmra.mxu3 %v936_v35 }
 0x283   :  { %v1014_v17 = vpop.f32.mrf.mxu3 }
 0x284   :  { %v1015_v27 = vadd.f32 %v1415_v36, %v1014_v17 }
 0x286   :  { %v1024_v37 = vadd.f32 %v1015_v27, %v1664_v22 }
 0x288   :  { %v1028_v38 = vmax.f32 %v1024_v37, 0.0 }
 0x28a   :  { %1032 = vst [vmem:[#allocation11] sm:$0xff] %v1028_v38 }
 0x28b   :  { %v1016_v39 = vpop.f32.mrf.mxu3 }
 0x28c   :  { %v1017_v40 = vadd.f32 %v1415_v36, %v1016_v39 }
 0x28e   :  { %v1025_v41 = vadd.f32 %v1017_v40, %v1666_v23 }
 0x290   :  { %v1029_v42 = vmax.f32 %v1025_v41, 0.0 }
 0x292   :  { %1033 = vst [vmem:[#allocation11 + $0x8] sm:$0xff] %v1029_v42 }
 0x293   :  { %v1019_v43 = vpop.f32.mrf.mxu3 }
 0x294   :  { %v1020_v25 = vadd.f32 %v1415_v36, %v1019_v43 }
 0x296   :  { %v1026_v44 = vadd.f32 %v1020_v25, %v1671_v26 }
 0x298   :  { %v1030_v45 = vmax.f32 %v1026_v44, 0.0 }
 0x29a   :  { %1034 = vst [vmem:[#allocation11 + $0x10] sm:$0xff] %v1030_v45 }
 0x29b   :  { %v1021_v46 = vpop.f32.mrf.mxu3 }
 0x29c   :  { %v1022_v47 = vadd.f32 %v1415_v36, %v1021_v46 }
 0x29e   :  { %v1027_v22 = vadd.f32 %v1022_v47, %v1668_v24 }
 0x2a0   :  { %v1031_v48 = vmax.f32 %v1027_v22, 0.0 }
 0x2a2   :  { %1035 = vst [vmem:[#allocation11 + $0x18] sm:$0xff] %v1031_v48 }
 0x2a3   :  { %1048 = dma.vmem_to_hbm [thread:$0]  %s1041_s17, 512, %s1043_s20, [#allocation4], %s1573_s27, %s1573_s27, %s1574_s28  }
 0x2a4   :  { %1566 = dma.done.wait [#allocation4], 512  }
 0x2a5   :  { %1567 = vsyncadd [#allocation4], 4294966784 }
 0x2a6   :  { %1053 = vsyncpa [#allocation3], 1 }
 0x2a7   :  { %1054 = vsyncpa [#allocation6], 1 }
 0x2a8   :  { %1055 = vsyncpa [#allocation9], 1 }
 0x2a9   :  { %1056 = vsyncpa [#allocation4], 1 }

</bundles_post_ra>
